<compile_context>
chip_gen: v5e
topology: v5e:2x2
jax: 0.10.0
libtpu: 0.0.40
codegen_flags: <defaults>
</compile_context>

<pallas_src>
import jax
import jax.numpy as jnp
from jax.experimental import pallas as pl
from jax.experimental.pallas import tpu as pltpu


def _action_head_kernel(own_ref,     # [TBU, E]   flattened own-unit rows (B-major, U-minor)
                        core_ref,    # [TB, C]    one core row per batch element
                        mask_ref,    # [TBU, 1]   1.0 / 1e-9 row mask
                        w1o_ref,     # [E, H]     W1 rows that multiply own-unit features
                        w1c_ref,     # [C, H]     W1 rows that multiply core features
                        b1_ref,      # [1, H]
                        w2_ref,      # [H, AC]
                        b2_ref,      # [1, AC]
                        logits_ref,  # [TBU, AC]
                        ar_ref):     # [TBU, H]
    tbu, h = ar_ref.shape
    tb = core_ref.shape[0]
    u = tbu // tb

    # fc1: per-row own contribution + per-batch core contribution (broadcast over U units)
    h_own = jnp.dot(own_ref[...], w1o_ref[...], preferred_element_type=jnp.float32)   # [TBU, H]
    h_core = jnp.dot(core_ref[...], w1c_ref[...], preferred_element_type=jnp.float32)  # [TB, H]
    # grouped sublane broadcast [TB,H] -> [TB,U,H] -> [TBU,H]; a no-op relayout when U % 8 == 0
    h_core = jnp.broadcast_to(h_core[:, None, :], (tb, u, h)).reshape(tbu, h)

    ar = jnp.maximum(h_own + h_core + b1_ref[...], jnp.float32(0.0))
    ar_ref[...] = ar.astype(ar_ref.dtype)

    # fc2 + softmax over the action dimension
    z = jnp.dot(ar, w2_ref[...], preferred_element_type=jnp.float32) + b2_ref[...]
    z = z - jnp.max(z, axis=-1, keepdims=True)
    e = jnp.exp(z)
    d = jnp.sum(e, axis=-1, keepdims=True)
    r = pl.reciprocal(d, approx=True)
    r = r * (jnp.float32(2.0) - d * r)          # one Newton step -> f32-accurate 1/d
    probs = e * r

    # multiplicative row mask applied AFTER softmax, matching the PyTorch module
    logits_ref[...] = (probs * mask_ref[...]).astype(logits_ref.dtype)


def action_head(core_output, own_unit_embeddings, nr_units, nr_own_flags,
                w1, b1, w2, b2, *, batch_tile=None):
    """
    core_output:           [B, 1, C]  float32
    own_unit_embeddings:   [B, U, E]  float32
    nr_units, nr_own_flags:[B] or [B, 1] int
    w1: [E+C, H], b1: [H], w2: [H, AC], b2: [AC]   (Linear weights stored [in, out])
    returns (action_logits [B, U, AC], autoregressive_embedding [B, U, H])
    """
    B, U, E = own_unit_embeddings.shape
    C = core_output.shape[-1]
    H = w1.shape[1]
    AC = w2.shape[1]
    assert w1.shape[0] == E + C, "W1 must have E+C input rows (own features first)"

    # --- batch tile: ~4096 flattened rows per grid step; keep >=2 grid steps when possible ---
    if batch_tile is None:
        batch_tile = max(1, 4096 // max(U, 1))
        if B > 1:
            batch_tile = min(batch_tile, (B + 1) // 2)   # G >= 2 so v7x's 2 TCs both get work
    TB = max(1, min(int(batch_tile), B))
    TB = ((TB + 7) // 8) * 8                              # 8-aligned: legal (8,128) blocks always
    B_pad = ((B + TB - 1) // TB) * TB
    G = B_pad // TB
    TBU = TB * U
    pad_b = B_pad - B

    # --- wrapper-side layout plumbing (no `combined` materialization) ---
    own3 = own_unit_embeddings.astype(jnp.float32)
    core2 = core_output.astype(jnp.float32).reshape(B, C)
    n_units = nr_units.reshape(B).astype(jnp.int32)
    flags = nr_own_flags.reshape(B).astype(jnp.int32)
    if pad_b:
        own3 = jnp.pad(own3, ((0, pad_b), (0, 0), (0, 0)))
        core2 = jnp.pad(core2, ((0, pad_b), (0, 0)))
        n_units = jnp.pad(n_units, (0, pad_b))            # padded rows -> empty mask, sliced off
        flags = jnp.pad(flags, (0, pad_b))
    own_flat = own3.reshape(B_pad * U, E)                  # contiguous -> free view

    # single precomputed row mask (1.0 for flag <= u < n_units, else 1e-9)
    u_idx = jnp.arange(U, dtype=jnp.int32)[None, :]
    inside = (u_idx >= flags[:, None]) & (u_idx < n_units[:, None])
    row_mask = jnp.where(inside, jnp.float32(1.0), jnp.float32(1e-9)).reshape(B_pad * U, 1)

    # split W1 into the own-feature and core-feature halves (cat order: [own, core])
    w1f = w1.astype(jnp.float32)
    w1_own = w1f[:E, :]
    w1_core = w1f[E:, :]
    b1_2 = b1.reshape(1, H).astype(jnp.float32)
    w2f = w2.astype(jnp.float32)
    b2_2 = b2.reshape(1, AC).astype(jnp.float32)

    grid_spec = pltpu.PrefetchScalarGridSpec(
        num_scalar_prefetch=0,
        grid=(G,),
        in_specs=[
            pl.BlockSpec((TBU, E), lambda g: (g, 0)),      # own rows
            pl.BlockSpec((TB, C), lambda g: (g, 0)),       # core rows (one per batch element)
            pl.BlockSpec((TBU, 1), lambda g: (g, 0)),      # row mask
            pl.BlockSpec((E, H), lambda g: (0, 0)),        # W1_own
            pl.BlockSpec((C, H), lambda g: (0, 0)),        # W1_core
            pl.BlockSpec((1, H), lambda g: (0, 0)),        # b1
            pl.BlockSpec((H, AC), lambda g: (0, 0)),       # W2
            pl.BlockSpec((1, AC), lambda g: (0, 0)),       # b2
        ],
        out_specs=[
            pl.BlockSpec((TBU, AC), lambda g: (g, 0)),
            pl.BlockSpec((TBU, H), lambda g: (g, 0)),
        ],
    )

    # VMEM budget: every block is double-buffered; keep explicit headroom.
    block_bytes = 4 * (TBU * E + TB * C + TBU + TBU * H + TBU * AC)
    weight_bytes = 4 * ((E + C) * H + H + H * AC + AC)
    vmem_limit = int(max(32 * 1024 * 1024,
                         min(64 * 1024 * 1024, 4 * block_bytes + 2 * weight_bytes)))

    logits_flat, ar_flat = pl.pallas_call(
        _action_head_kernel,
        out_shape=(
            jax.ShapeDtypeStruct((B_pad * U, AC), jnp.float32),
            jax.ShapeDtypeStruct((B_pad * U, H), jnp.float32),
        ),
        grid_spec=grid_spec,
        compiler_params=pltpu.CompilerParams(
            dimension_semantics=("parallel",),
            vmem_limit_bytes=vmem_limit,
        ),
    )(own_flat, core2, row_mask, w1_own, w1_core, b1_2, w2f, b2_2)

    action_logits = logits_flat.reshape(B_pad, U, AC)[:B]
    ar_emb = ar_flat.reshape(B_pad, U, H)[:B]
    return action_logits, ar_emb


def action_head_reference(core_output, own, nr_units, nr_own_flags, w1, b1, w2, b2):
    B, U, _ = own.shape
    C = core_output.shape[-1]
    core_rep = jnp.broadcast_to(core_output, (B, U, C))
    combined = jnp.concatenate([own, core_rep], axis=-1)
    ar = jax.nn.relu(combined @ w1 + b1)
    probs = jax.nn.softmax(ar @ w2 + b2, axis=-1)
    u = jnp.arange(U)[None, :, None]
    f = nr_own_flags.reshape(B, 1, 1)
    n = nr_units.reshape(B, 1, 1)
    mask = jnp.where((u >= f) & (u < n), 1.0, 1e-9)
    return probs * mask, ar


if __name__ == "__main__":
    # Small shapes consistent with the module:
    #   core_output_size C=32, unit_embedding_size E=16, max_units U=8,
    #   autoregressive_embedding_channels=2, map_skip_dims=(4,4) -> H = 2*16 = 32,
    #   ACTION_COUNT = 8.  B=20 exercises batch padding and a 2-step grid.
    B, U, C, E, H, AC = 20, 8, 32, 16, 32, 8

    key = jax.random.PRNGKey(0)
    k1, k2, k3, k4, k5, k6, k7, k8 = jax.random.split(key, 8)

    core = jax.random.normal(k1, (B, 1, C), dtype=jnp.float32)
    own = jax.random.normal(k2, (B, U, E), dtype=jnp.float32)
    nr_units = jax.random.randint(k7, (B, 1), 0, U + 1).astype(jnp.int32)
    nr_own_flags = jax.random.randint(k8, (B, 1), 0, U + 1).astype(jnp.int32)

    # Linear weights stored [in, out] (transpose of PyTorch nn.Linear.weight)
    w1 = jax.random.normal(k3, (E + C, H), dtype=jnp.float32) * 0.1
    b1 = jax.random.normal(k4, (H,), dtype=jnp.float32) * 0.01
    w2 = jax.random.normal(k5, (H, AC), dtype=jnp.float32) * 0.1
    b2 = jax.random.normal(k6, (AC,), dtype=jnp.float32) * 0.01

    logits, ar_emb = action_head(core, own, nr_units, nr_own_flags, w1, b1, w2, b2)
    logits = jax.block_until_ready(logits)
    ar_emb = jax.block_until_ready(ar_emb)

    ref_logits, ref_ar = action_head_reference(core, own, nr_units, nr_own_flags, w1, b1, w2, b2)

    assert logits.shape == (B, U, AC)
    assert ar_emb.shape == (B, U, H)
    assert jnp.allclose(logits, ref_logits, atol=1e-4, rtol=1e-4), "action_logits mismatch"
    assert jnp.allclose(ar_emb, ref_ar, atol=1e-4, rtol=1e-4), "autoregressive_embedding mismatch"

    print("KERNEL_OK")
</pallas_src>

<mosaic_0001>
module attributes {stable_mosaic.version = 11 : i64} {
  func.func @_action_head_kernel(%arg0: i32, %arg1: memref<128x16xf32, #tpu.memory_space<vmem>>, %arg2: memref<16x32xf32, #tpu.memory_space<vmem>>, %arg3: memref<128x1xf32, #tpu.memory_space<vmem>>, %arg4: memref<16x32xf32, #tpu.memory_space<vmem>>, %arg5: memref<32x32xf32, #tpu.memory_space<vmem>>, %arg6: memref<1x32xf32, #tpu.memory_space<vmem>>, %arg7: memref<32x8xf32, #tpu.memory_space<vmem>>, %arg8: memref<1x8xf32, #tpu.memory_space<vmem>>, %arg9: memref<128x8xf32, #tpu.memory_space<vmem>>, %arg10: memref<128x32xf32, #tpu.memory_space<vmem>>) attributes {dimension_semantics = [#tpu.dimension_semantics<parallel>], iteration_bounds = array<i64: 2>, scalar_prefetch = 0 : i64, scratch_operands = 0 : i64, tpu.core_type = #tpu.core_type<tc>, window_params = [{transform_indices = @transform_0, window_bounds = array<i64: 128, 16>}, {transform_indices = @transform_1, window_bounds = array<i64: 16, 32>}, {transform_indices = @transform_2, window_bounds = array<i64: 128, 1>}, {pipeline_mode = #tpu.pipeline_mode<synchronous>, transform_indices = @transform_3, window_bounds = array<i64: 16, 32>}, {pipeline_mode = #tpu.pipeline_mode<synchronous>, transform_indices = @transform_4, window_bounds = array<i64: 32, 32>}, {pipeline_mode = #tpu.pipeline_mode<synchronous>, transform_indices = @transform_5, window_bounds = array<i64: 1, 32>}, {pipeline_mode = #tpu.pipeline_mode<synchronous>, transform_indices = @transform_6, window_bounds = array<i64: 32, 8>}, {pipeline_mode = #tpu.pipeline_mode<synchronous>, transform_indices = @transform_7, window_bounds = array<i64: 1, 8>}, {transform_indices = @transform_8, window_bounds = array<i64: 128, 8>}, {transform_indices = @transform_9, window_bounds = array<i64: 128, 32>}]} {
    %c0 = arith.constant 0 : index
    %c0_0 = arith.constant 0 : index
    %0 = vector.load %arg1[%c0, %c0_0] : memref<128x16xf32, #tpu.memory_space<vmem>>, vector<128x16xf32>
    %c0_1 = arith.constant 0 : index
    %c0_2 = arith.constant 0 : index
    %1 = vector.load %arg4[%c0_1, %c0_2] : memref<16x32xf32, #tpu.memory_space<vmem>>, vector<16x32xf32>
    %cst = arith.constant dense<0.000000e+00> : vector<128x32xf32>
    %2 = tpu.matmul %0, %1, %cst {dimension_numbers = #tpu.dot_dimension_numbers<[1], [0], [0], [1], [0, 0, 1, 1], [], []>} : vector<128x16xf32>, vector<16x32xf32>, vector<128x32xf32> -> vector<128x32xf32>
    %c0_3 = arith.constant 0 : index
    %c0_4 = arith.constant 0 : index
    %3 = vector.load %arg2[%c0_3, %c0_4] : memref<16x32xf32, #tpu.memory_space<vmem>>, vector<16x32xf32>
    %c0_5 = arith.constant 0 : index
    %c0_6 = arith.constant 0 : index
    %4 = vector.load %arg5[%c0_5, %c0_6] : memref<32x32xf32, #tpu.memory_space<vmem>>, vector<32x32xf32>
    %cst_7 = arith.constant dense<0.000000e+00> : vector<16x32xf32>
    %5 = tpu.matmul %3, %4, %cst_7 {dimension_numbers = #tpu.dot_dimension_numbers<[1], [0], [0], [1], [0, 0, 1, 1], [], []>} : vector<16x32xf32>, vector<32x32xf32>, vector<16x32xf32> -> vector<16x32xf32>
    %6 = vector.shape_cast %5 : vector<16x32xf32> to vector<16x1x32xf32>
    %7 = vector.shape_cast %6 : vector<16x1x32xf32> to vector<16x1x32xf32>
    %8 = vector.broadcast %7 : vector<16x1x32xf32> to vector<16x8x32xf32>
    %9 = vector.shape_cast %8 : vector<16x8x32xf32> to vector<128x32xf32>
    %10 = arith.addf %2, %9 : vector<128x32xf32>
    %c0_8 = arith.constant 0 : index
    %c0_9 = arith.constant 0 : index
    %11 = vector.load %arg6[%c0_8, %c0_9] : memref<1x32xf32, #tpu.memory_space<vmem>>, vector<1x32xf32>
    %12 = vector.broadcast %11 : vector<1x32xf32> to vector<128x32xf32>
    %13 = arith.addf %10, %12 : vector<128x32xf32>
    %cst_10 = arith.constant 0.000000e+00 : f32
    %14 = vector.broadcast %cst_10 : f32 to vector<128x32xf32>
    %15 = arith.maximumf %13, %14 : vector<128x32xf32>
    %c0_11 = arith.constant 0 : index
    %c0_12 = arith.constant 0 : index
    %16 = vector.load %arg10[%c0_11, %c0_12] : memref<128x32xf32, #tpu.memory_space<vmem>>, vector<128x32xf32>
    tpu.vector_store %arg10[%c0_11, %c0_12], %15 {strides = array<i32>} : memref<128x32xf32, #tpu.memory_space<vmem>>, vector<128x32xf32>,
    %c0_13 = arith.constant 0 : index
    %c0_14 = arith.constant 0 : index
    %17 = vector.load %arg7[%c0_13, %c0_14] : memref<32x8xf32, #tpu.memory_space<vmem>>, vector<32x8xf32>
    %cst_15 = arith.constant dense<0.000000e+00> : vector<128x8xf32>
    %18 = tpu.matmul %15, %17, %cst_15 {dimension_numbers = #tpu.dot_dimension_numbers<[1], [0], [0], [1], [0, 0, 1, 1], [], []>} : vector<128x32xf32>, vector<32x8xf32>, vector<128x8xf32> -> vector<128x8xf32>
    %c0_16 = arith.constant 0 : index
    %c0_17 = arith.constant 0 : index
    %19 = vector.load %arg8[%c0_16, %c0_17] : memref<1x8xf32, #tpu.memory_space<vmem>>, vector<1x8xf32>
    %20 = vector.broadcast %19 : vector<1x8xf32> to vector<128x8xf32>
    %21 = arith.addf %18, %20 : vector<128x8xf32>
    %cst_18 = arith.constant dense<0xFF800000> : vector<128xf32>
    %22 = vector.multi_reduction <maximumf>, %21, %cst_18 [1] : vector<128x8xf32> to vector<128xf32>
    %23 = vector.shape_cast %22 : vector<128xf32> to vector<128x1xf32>
    %24 = vector.broadcast %23 : vector<128x1xf32> to vector<128x8xf32>
    %25 = arith.subf %21, %24 : vector<128x8xf32>
    %26 = math.exp %25 : vector<128x8xf32>
    %cst_19 = arith.constant dense<0.000000e+00> : vector<128xf32>
    %27 = vector.multi_reduction <add>, %26, %cst_19 [1] : vector<128x8xf32> to vector<128xf32>
    %28 = vector.shape_cast %27 : vector<128xf32> to vector<128x1xf32>
    %29 = tpu.reciprocal %28 {approx = true} : vector<128x1xf32> -> vector<128x1xf32>
    %30 = arith.mulf %28, %29 : vector<128x1xf32>
    %cst_20 = arith.constant 2.000000e+00 : f32
    %31 = vector.broadcast %cst_20 : f32 to vector<128x1xf32>
    %32 = arith.subf %31, %30 : vector<128x1xf32>
    %33 = arith.mulf %29, %32 : vector<128x1xf32>
    %34 = vector.broadcast %33 : vector<128x1xf32> to vector<128x8xf32>
    %35 = arith.mulf %26, %34 : vector<128x8xf32>
    %c0_21 = arith.constant 0 : index
    %c0_22 = arith.constant 0 : index
    %36 = vector.load %arg3[%c0_21, %c0_22] : memref<128x1xf32, #tpu.memory_space<vmem>>, vector<128x1xf32>
    %37 = vector.broadcast %36 : vector<128x1xf32> to vector<128x8xf32>
    %38 = arith.mulf %35, %37 : vector<128x8xf32>
    %c0_23 = arith.constant 0 : index
    %c0_24 = arith.constant 0 : index
    %39 = vector.load %arg9[%c0_23, %c0_24] : memref<128x8xf32, #tpu.memory_space<vmem>>, vector<128x8xf32>
    tpu.vector_store %arg9[%c0_23, %c0_24], %38 {strides = array<i32>} : memref<128x8xf32, #tpu.memory_space<vmem>>, vector<128x8xf32>,
    return
  }
  func.func @transform_0(%arg0: i32) -> (i32, i32) {
    %c0_i32 = arith.constant 0 : i32
    %c0_i32_0 = arith.constant 0 : i32
    return %arg0, %c0_i32 : i32, i32
  }
  func.func @transform_1(%arg0: i32) -> (i32, i32) {
    %c0_i32 = arith.constant 0 : i32
    %c0_i32_0 = arith.constant 0 : i32
    return %arg0, %c0_i32 : i32, i32
  }
  func.func @transform_2(%arg0: i32) -> (i32, i32) {
    %c0_i32 = arith.constant 0 : i32
    %c0_i32_0 = arith.constant 0 : i32
    return %arg0, %c0_i32 : i32, i32
  }
  func.func @transform_3(%arg0: i32) -> (i32, i32) {
    %c0_i32 = arith.constant 0 : i32
    %c0_i32_0 = arith.constant 0 : i32
    %c0_i32_1 = arith.constant 0 : i32
    return %c0_i32, %c0_i32_0 : i32, i32
  }
  func.func @transform_4(%arg0: i32) -> (i32, i32) {
    %c0_i32 = arith.constant 0 : i32
    %c0_i32_0 = arith.constant 0 : i32
    %c0_i32_1 = arith.constant 0 : i32
    return %c0_i32, %c0_i32_0 : i32, i32
  }
  func.func @transform_5(%arg0: i32) -> (i32, i32) {
    %c0_i32 = arith.constant 0 : i32
    %c0_i32_0 = arith.constant 0 : i32
    %c0_i32_1 = arith.constant 0 : i32
    return %c0_i32, %c0_i32_0 : i32, i32
  }
  func.func @transform_6(%arg0: i32) -> (i32, i32) {
    %c0_i32 = arith.constant 0 : i32
    %c0_i32_0 = arith.constant 0 : i32
    %c0_i32_1 = arith.constant 0 : i32
    return %c0_i32, %c0_i32_0 : i32, i32
  }
  func.func @transform_7(%arg0: i32) -> (i32, i32) {
    %c0_i32 = arith.constant 0 : i32
    %c0_i32_0 = arith.constant 0 : i32
    %c0_i32_1 = arith.constant 0 : i32
    return %c0_i32, %c0_i32_0 : i32, i32
  }
  func.func @transform_8(%arg0: i32) -> (i32, i32) {
    %c0_i32 = arith.constant 0 : i32
    %c0_i32_0 = arith.constant 0 : i32
    return %arg0, %c0_i32 : i32, i32
  }
  func.func @transform_9(%arg0: i32) -> (i32, i32) {
    %c0_i32 = arith.constant 0 : i32
    %c0_i32_0 = arith.constant 0 : i32
    return %arg0, %c0_i32 : i32, i32
  }
}

</mosaic_0001>

<bundles_post_ra>
// kernel: tpu_custom_call.1
= control target key start
LH: loop header
LB: loop body
LE: loop exit
PB: predicated region body
PF: predicated region fallthrough
CT: control target
= control target key end

     0   :  { %s1448_s30 = smov 0   ;;  %s1923_s0 = inlined_call_operand.vmem [shape: f32[256,16], index: 0, kind: input, shape index: {}]   ;;  %s1924_s1 = inlined_call_operand.vmem [shape: f32[32,32], index: 1, kind: input, shape index: {}]   ;;  %s1925_s2 = inlined_call_operand.vmem [shape: f32[256,1], index: 2, kind: input, shape index: {}]   ;;  %s1926_s3 = inlined_call_operand.vmem [shape: f32[16,32], index: 3, kind: input, shape index: {}]   ;;  %s1927_s4 = inlined_call_operand.vmem [shape: f32[32,32], index: 4, kind: input, shape index: {}]   ;;  %s1928_s5 = inlined_call_operand.vmem [shape: f32[1,32], index: 5, kind: input, shape index: {}]   ;;  %s1929_s6 = inlined_call_operand.vmem [shape: f32[32,8], index: 6, kind: input, shape index: {}]   ;;  %s1930_s7 = inlined_call_operand.vmem [shape: f32[1,8], index: 7, kind: input, shape index: {}]   ;;  %s1931_s8 = inlined_call_operand.vmem [shape: f32[256,8], index: 8, kind: output, shape index: {0}]   ;;  %s1932_s9 = inlined_call_operand.vmem [shape: f32[256,32], index: 9, kind: output, shape index: {1}]  }
   0x1 LB: > { %s1250_s10 = sadd.s32 4294967295, %s1395_s30   ;;  %p1254_p0 = scmp.ge.s32.totalorder %s1395_s30, 1  ;;  %s1395_s30 = sphi %s1448_s30, %s20_s30  }
   0x2   : > { %p313_p1 = scmp.lt.s32.totalorder %s1395_s30, 3 }
   0x4   : > { %p314_p2 = pnand %p1254_p0, %p313_p1 }
   0x5   : > { %s1257_s15 = sshll.u32 (!%p314_p2), %s1250_s10, 1  ;;  %s1255_s16 = sshll.u32 (!%p314_p2), %s1250_s10, 4 }
   0x6   : > { %317 = sbr.rel (%p314_p2) target bundleno = 624 (0x270), region = 52  ;;  %p371_p3 = scmp.lt.s32.totalorder (!%p314_p2), %s1257_s15, 3 }
   0x7   : > { %p365_p4 = scmp.lt.s32.totalorder (!%p314_p2), %s1255_s16, 31 }
   0xb   : > { %v417_v0 = vld [vmem:[%s1927_s4 + $0x18] sm:$0xff]  ;;  %v416_v1 = vld [vmem:[%s1927_s4 + $0x10] sm:$0xff]  ;;  %v411_v2 = vld [vmem:[%s1926_s3 + $0x8] sm:$0xff]  ;;  %s1934_s15 = smov (!%p371_p3, %s1257_s15), 3  ;;  %s1936_s16 = smov (!%p365_p4, %s1255_s16), 31  ;;  %vm418_vm0 = vcmask 261120  }
   0xc   : > { %437 = vmatpush.msra.mxu0 %v417_v0  ;;  %1301 = vmatpush.msra.mxu3 %v417_v0  ;;  %v410_v3 = vld [vmem:[%s1926_s3] sm:$0xff]  ;;  %v415_v4 = vld [vmem:[%s1927_s4 + $0x8] sm:$0xff]  ;;  %s1258_s25 = sshll.u32 %s1934_s15, 3  ;;  %s1477_s29 = sshll.u32 %s1936_s16, 3  ;;  %vm496_vm1 = vcmask 130048   ;;  %v665_v24 = vld [vmem:[%s1929_s6 + $0x18] sm:$0xff] }
   0xd   : > { %1305 = vmatpush.msra.mxu1 %v411_v2  ;;  %v414_v5 = vld [vmem:[%s1927_s4] sm:$0xff]  ;;  %s374_s28 = scalar_lea.vmem %s1924_s1, %s1258_s25  ;;  %s1483_s12 = scalar_lea.vmem %s1923_s0, %s1477_s29  ;;  %730 = vmatpush.msra.mxu2 %v665_v24  ;;  %v664_v25 = vld [vmem:[%s1929_s6 + $0x10] sm:$0xff]  ;;  %v663_v26 = vld [vmem:[%s1929_s6 + $0x8] sm:$0xff]  ;;  %vm783_vm2 = vcmask 64512  }
   0xe   : > { %438 = vmatpush.msra.mxu0 %v416_v1  ;;  %1302 = vmatpush.msra.mxu3 %v416_v1  ;;  %v412_v6 = vld [vmem:[%s374_s28] sm:$0xff]  ;;  %v413_v7 = vld [vmem:[%s374_s28 + $0x8] sm:$0xff]  ;;  %v401_v8 = vld [vmem:[%s1483_s12 + $0x38] sm:$0xff]  ;;  %s1547_s25 = scalar_lea.vmem %s1932_s9, %s1477_s29  ;;  %s1585_s28 = scalar_lea.vmem %s1925_s2, %s1477_s29 }
   0xf   : > { %1306 = vmatpush.msra.mxu1 %v410_v3  ;;  %v394_v9 = vld [vmem:[%s1483_s12] sm:$0xff]  ;;  %v395_v11 = vld [vmem:[%s1483_s12 + $0x8] sm:$0xff]  ;;  %v396_v13 = vld [vmem:[%s1483_s12 + $0x10] sm:$0xff]  ;;  %731 = vmatpush.msra.mxu2 %v664_v25  ;;  %s1858_s14 = scalar_lea.vmem %s1931_s8, %s1477_s29 }
  0x10   : > { %439 = vmatpush.msra.mxu0 %v415_v4  ;;  %1303 = vmatpush.msra.mxu3 %v415_v4  ;;  %v402_v10 = vld [vmem:[%s1483_s12 + $0x40] sm:$0xff]  ;;  %v403_v12 = vld [vmem:[%s1483_s12 + $0x48] sm:$0xff]  ;;  %v404_v14 = vld [vmem:[%s1483_s12 + $0x50] sm:$0xff] }
  0x11   : > { %1274 = vmatmul.msk.f32.vlgmr.msra.gmra.mxu1 %vm496_vm1, %v401_v8  ;;  %v397_v15 = vld [vmem:[%s1483_s12 + $0x18] sm:$0xff]  ;;  %v398_v17 = vld [vmem:[%s1483_s12 + $0x20] sm:$0xff]  ;;  %v399_v19 = vld [vmem:[%s1483_s12 + $0x28] sm:$0xff]  ;;  %732 = vmatpush.msra.mxu2 %v663_v26  ;;  %v1397_v8 = vmov 0  }
  0x12   : > { %440 = vmatpush.msra.mxu0 %v414_v5  ;;  %1304 = vmatpush.msra.mxu3 %v414_v5  ;;  %v405_v16 = vld [vmem:[%s1483_s12 + $0x58] sm:$0xff]  ;;  %v406_v18 = vld [vmem:[%s1483_s12 + $0x60] sm:$0xff]  ;;  %v407_v20 = vld [vmem:[%s1483_s12 + $0x68] sm:$0xff] }
  0x13   : > { %1265 = vmatmul.msk.f32.vlgmr.msra.gmra.mxu0 %vm418_vm0, %v412_v6  ;;  %1266 = vmatmul.msk.f32.vlgmr.msra.gmra.mxu3 %vm418_vm0, %v413_v7  ;;  %v400_v21 = vld [vmem:[%s1483_s12 + $0x30] sm:$0xff]  ;;  %v409_v23 = vld [vmem:[%s1483_s12 + $0x78] sm:$0xff]  ;;  %v662_v27 = vld [vmem:[%s1929_s6] sm:$0xff] }
  0x14   : > { %559 = vmatpush.msrb.mxu0 %v411_v2  ;;  %v408_v22 = vld [vmem:[%s1483_s12 + $0x70] sm:$0xff]  ;;  %1307 = vmatpush.msrb.mxu3 %v665_v24  ;;  %v1537_v32 = vld [vmem:[%s1928_s5] ss:$0 sm:$0xff] }
  0x15   : > { %733 = vmatpush.msra.mxu2 %v662_v27  ;;  %1320 = vset.pattern.permute.xlu2 %v1397_v8 }
  0x16   : > { %560 = vmatpush.msrb.mxu0 %v410_v3  ;;  %1308 = vmatpush.msrb.mxu3 %v664_v25 }
  0x17   : > { %1322 = vset.pattern.permute.xlu1 %v1397_v8  ;;  %1321 = vset.pattern.permute.xlu0 %v1397_v8  ;;  %v1019_v8 = vld [vmem:[%s1585_s28 + $0x58] sm:$0xff] }
  0x18   : > { %1309 = vmatpush.msrb.mxu3 %v663_v26 }
  0x19   : > { %1275 = vmatmul.msk.f32.gmra.mxu1 %vm496_vm1, %v402_v10 }
  0x1a   : > { %1310 = vmatpush.msrb.mxu3 %v662_v27  ;;  %v1010_v27 = vld [vmem:[%s1585_s28 + $0x10] sm:$0xff] }
  0x1b   : > { %1267 = vmatmul.msk.f32.vlgmr.msrb.gmra.mxu0 %vm496_vm1, %v394_v9  ;;  %v1008_v9 = vld [vmem:[%s1585_s28] sm:$0xff]  ;;  %1036 = vperm.xlu1 %1322, %v1010_v27  }
  0x1c   : > { %1026 = vperm.xlu2 %1320, %v1008_v9  }
  0x21   : > { %1276 = vmatmul.msk.f32.gmra.mxu1 %vm496_vm1, %v403_v12 }
  0x23   : > { %1268 = vmatmul.msk.f32.gmra.mxu0 %vm496_vm1, %v395_v11 }
  0x29   : > { %1277 = vmatmul.msk.f32.gmra.mxu1 %vm496_vm1, %v404_v14 }
  0x2b   : > { %1269 = vmatmul.msk.f32.gmra.mxu0 %vm496_vm1, %v396_v13 }
  0x31   : > { %1278 = vmatmul.msk.f32.gmra.mxu1 %vm496_vm1, %v405_v16 }
  0x33   : > { %1270 = vmatmul.msk.f32.gmra.mxu0 %vm496_vm1, %v397_v15 }
  0x39   : > { %1279 = vmatmul.msk.f32.gmra.mxu1 %vm496_vm1, %v406_v18 }
  0x3b   : > { %1271 = vmatmul.msk.f32.gmra.mxu0 %vm496_vm1, %v398_v17 }
  0x41   : > { %1280 = vmatmul.msk.f32.gmra.mxu1 %vm496_vm1, %v407_v20 }
  0x43   : > { %1272 = vmatmul.msk.f32.gmra.mxu0 %vm496_vm1, %v399_v19 }
  0x49   : > { %1281 = vmatmul.msk.f32.gmra.mxu1 %vm496_vm1, %v408_v22  ;;  %v1011_v22 = vld [vmem:[%s1585_s28 + $0x18] sm:$0xff] }
  0x4a   : > { %1041 = vperm.xlu2 %1320, %v1011_v22  }
  0x4b   : > { %1273 = vmatmul.msk.f32.gmra.mxu0 %vm496_vm1, %v400_v21 }
  0x51   : > { %1282 = vmatmul.msk.f32.gmra.mxu1 %vm496_vm1, %v409_v23 }
  0x8e   : > { %v583_v30 = vpop.f32.mrf.mxu1 }
  0x90   : > { %v1531_v28 = vpop.f32.mrf.mxu0 }
  0x91   : > { %v456_v29 = vrot.slane %v1531_v28, 7  ;;  %v464_v35 = vperm.slane %v1531_v28, 0  ;;  %v450_v43 = vrot.slane %v1531_v28, 1  ;;  %v451_v56 = vrot.slane %v1531_v28, 2 }
  0x92   : > { %v452_v4 = vrot.slane %v1531_v28, 3  ;;  %v453_v18 = vrot.slane %v1531_v28, 4 }
  0x93   : > { %v471_v31 = vperm.slane %v456_v29, 0  ;;  %v465_v48 = vperm.slane %v450_v43, 0  ;;  %v466_v61 = vperm.slane %v451_v56, 0 }
  0x94   : > { %v467_v11 = vperm.slane %v452_v4, 0  ;;  %v468_v24 = vperm.slane %v453_v18, 0  ;;  %v1017_v4 = vld [vmem:[%s1585_s28 + $0x48] sm:$0xff] }
  0x95   : > { %v584_v33 = vadd.f32 %v583_v30, %v471_v31 }
  0x96   : > { %v1549_v37 = vpop.f32.mrf.mxu3  ;;  %v586_v40 = vpop.f32.mrf.mxu1 }
  0x97   : > { %v1540_v34 = vadd.f32 %v1537_v32, %v584_v33  ;;  %v457_v41 = vrot.slane %v1549_v37, 1  ;;  %v472_v44 = vperm.slane %v1549_v37, 0  ;;  %v458_v58 = vrot.slane %v1549_v37, 2 }
  0x98   : > { %v562_v36 = vpop.f32.mrf.mxu0  ;;  %v459_v6 = vrot.slane %v1549_v37, 3  ;;  %v460_v20 = vrot.slane %v1549_v37, 4 }
  0x99   : > { %v637_v38 = vmax.f32 %v1540_v34, 0.0  ;;  %v563_v39 = vadd.f32 %v562_v36, %v464_v35  ;;  %v587_v46 = vadd.f32 %v586_v40, %v472_v44  ;;  %v473_v47 = vperm.slane %v457_v41, 0  ;;  %v1012_v36 = vld [vmem:[%s1585_s28 + $0x20] sm:$0xff]  ;;  %v1013_v44 = vld [vmem:[%s1585_s28 + $0x28] sm:$0xff] }
  0x9a   : > { %v474_v63 = vperm.slane %v458_v58, 0  ;;  %v475_v13 = vperm.slane %v459_v6, 0  ;;  %v476_v26 = vperm.slane %v460_v20, 0  ;;  %v454_v35 = vrot.slane %v1531_v28, 5  ;;  %1046 = vperm.xlu2 %1320, %v1012_v36   ;;  %1051 = vperm.xlu1 %1322, %v1013_v44  }
  0x9b   : > { %653 = vst.msk [vmem:[%s1547_s25 + $0x38] sm:$0xff] %vm418_vm0, %v637_v38  ;;  %v614_v42 = vadd.f32 %v1537_v32, %v563_v39  ;;  %v1564_v49 = vadd.f32 %v1537_v32, %v587_v46  ;;  %v461_v40 = vrot.slane %v1549_v37, 5  ;;  %v463_v6 = vrot.slane %v1549_v37, 7 }
  0x9c   : > { %v469_v43 = vperm.slane %v454_v35, 0 }
  0x9d   : > { %v630_v45 = vmax.f32 %v614_v42, 0.0  ;;  %v638_v53 = vmax.f32 %v1564_v49, 0.0 }
  0x9e   : > { %v589_v52 = vpop.f32.mrf.mxu1 }
  0x9f   : > { %646 = vst.msk [vmem:[%s1547_s25] sm:$0xff] %vm418_vm0, %v630_v45  ;;  %1283 = vmatmul.msk.f32.vlgmr.msra.gmra.mxu2 %vm418_vm0, %v630_v45  ;;  %v590_v54 = vadd.f32 %v589_v52, %v473_v47  ;;  %v1009_v45 = vld [vmem:[%s1585_s28 + $0x8] sm:$0xff]  ;;  %v477_v47 = vperm.slane %v461_v40, 0 }
  0xa0   : > { %v565_v50 = vpop.f32.mrf.mxu0  ;;  %654 = vst.msk [vmem:[%s1547_s25 + $0x40] sm:$0xff] %vm418_vm0, %v638_v53  ;;  %1031 = vperm.xlu0 %1321, %v1009_v45  }
  0xa1   : > { %v566_v51 = vadd.f32 %v565_v50, %v465_v48  ;;  %v623_v57 = vadd.f32 %v1537_v32, %v590_v54  ;;  %v455_v54 = vrot.slane %v1531_v28, 6 }
  0xa3   : > { %v615_v55 = vadd.f32 %v1537_v32, %v566_v51  ;;  %v639_v60 = vmax.f32 %v623_v57, 0.0  ;;  %v462_v57 = vrot.slane %v1549_v37, 6  ;;  %v1020_v37 = vld [vmem:[%s1585_s28 + $0x60] sm:$0xff] }
  0xa5   : > { %v631_v59 = vmax.f32 %v615_v55, 0.0  ;;  %655 = vst.msk [vmem:[%s1547_s25 + $0x48] sm:$0xff] %vm418_vm0, %v639_v60  ;;  %1292 = vmatmul.msk.f32.vlgmr.msrb.gmra.mxu3 %vm418_vm0, %v639_v60  ;;  %v1014_v55 = vld [vmem:[%s1585_s28 + $0x30] sm:$0xff] }
  0xa6   : > { %v592_v1 = vpop.f32.mrf.mxu1  ;;  %1056 = vperm.xlu2 %1320, %v1014_v55  }
  0xa7   : > { %647 = vst.msk [vmem:[%s1547_s25 + $0x8] sm:$0xff] %vm418_vm0, %v631_v59  ;;  %1284 = vmatmul.msk.f32.gmra.mxu2 %vm418_vm0, %v631_v59  ;;  %v593_v2 = vadd.f32 %v592_v1, %v474_v63  ;;  %v1016_v59 = vld [vmem:[%s1585_s28 + $0x40] sm:$0xff]  ;;  %v478_v63 = vperm.slane %v462_v57, 0 }
  0xa8   : > { %v568_v62 = vpop.f32.mrf.mxu0  ;;  %1066 = vperm.xlu0 %1321, %v1016_v59  }
  0xa9   : > { %v569_v0 = vadd.f32 %v568_v62, %v466_v61  ;;  %v624_v5 = vadd.f32 %v1537_v32, %v593_v2  ;;  %v1015_v61 = vld [vmem:[%s1585_s28 + $0x38] sm:$0xff]  ;;  %v470_v62 = vperm.slane %v455_v54, 0 }
  0xaa   : > { %1061 = vperm.xlu1 %1322, %v1015_v61  }
  0xab   : > { %v616_v3 = vadd.f32 %v1537_v32, %v569_v0  ;;  %v640_v10 = vmax.f32 %v624_v5, 0.0 }
  0xad   : > { %v632_v7 = vmax.f32 %v616_v3, 0.0  ;;  %656 = vst.msk [vmem:[%s1547_s25 + $0x50] sm:$0xff] %vm418_vm0, %v640_v10  ;;  %1293 = vmatmul.msk.f32.gmra.mxu3 %vm418_vm0, %v640_v10  ;;  %v1018_v10 = vld [vmem:[%s1585_s28 + $0x50] sm:$0xff] }
  0xae   : > { %v595_v15 = vpop.f32.mrf.mxu1  ;;  %1071 = vperm.xlu2 %1320, %v1017_v4  }
  0xaf   : > { %648 = vst.msk [vmem:[%s1547_s25 + $0x10] sm:$0xff] %vm418_vm0, %v632_v7  ;;  %1285 = vmatmul.msk.f32.gmra.mxu2 %vm418_vm0, %v632_v7  ;;  %v596_v16 = vadd.f32 %v595_v15, %v475_v13 }
  0xb0   : > { %v571_v12 = vpop.f32.mrf.mxu0  ;;  %1081 = vperm.xlu0 %1321, %v1019_v8  }
  0xb1   : > { %v572_v14 = vadd.f32 %v571_v12, %v467_v11  ;;  %v625_v19 = vadd.f32 %v1537_v32, %v596_v16  ;;  %v479_v11 = vperm.slane %v463_v6, 0  ;;  %v1662_v16 = vld [vmem:[%s1930_s7] ss:$0 sm:$0xff] }
  0xb2   : > { %1076 = vperm.xlu1 %1322, %v1018_v10  }
  0xb3   : > { %v617_v17 = vadd.f32 %v1537_v32, %v572_v14  ;;  %v641_v23 = vmax.f32 %v625_v19, 0.0 }
  0xb5   : > { %v633_v21 = vmax.f32 %v617_v17, 0.0  ;;  %657 = vst.msk [vmem:[%s1547_s25 + $0x58] sm:$0xff] %vm418_vm0, %v641_v23  ;;  %1294 = vmatmul.msk.f32.gmra.mxu3 %vm418_vm0, %v641_v23 }
  0xb6   : > { %v598_v30 = vpop.f32.mrf.mxu1  ;;  %1086 = vperm.xlu2 %1320, %v1020_v37  }
  0xb7   : > { %649 = vst.msk [vmem:[%s1547_s25 + $0x18] sm:$0xff] %vm418_vm0, %v633_v21  ;;  %1286 = vmatmul.msk.f32.gmra.mxu2 %vm418_vm0, %v633_v21  ;;  %v599_v31 = vadd.f32 %v598_v30, %v476_v26 }
  0xb8   : > { %v574_v25 = vpop.f32.mrf.mxu0 }
  0xb9   : > { %v575_v29 = vadd.f32 %v574_v25, %v468_v24  ;;  %v626_v39 = vadd.f32 %v1537_v32, %v599_v31 }
  0xbb   : > { %v618_v33 = vadd.f32 %v1537_v32, %v575_v29  ;;  %v642_v42 = vmax.f32 %v626_v39, 0.0 }
  0xbd   : > { %v634_v41 = vmax.f32 %v618_v33, 0.0  ;;  %658 = vst.msk [vmem:[%s1547_s25 + $0x60] sm:$0xff] %vm418_vm0, %v642_v42  ;;  %1295 = vmatmul.msk.f32.gmra.mxu3 %vm418_vm0, %v642_v42 }
  0xbe   : > { %v601_v50 = vpop.f32.mrf.mxu1 }
  0xbf   : > { %650 = vst.msk [vmem:[%s1547_s25 + $0x20] sm:$0xff] %vm418_vm0, %v634_v41  ;;  %1287 = vmatmul.msk.f32.gmra.mxu2 %vm418_vm0, %v634_v41  ;;  %v602_v51 = vadd.f32 %v601_v50, %v477_v47 }
  0xc0   : > { %v577_v46 = vpop.f32.mrf.mxu0 }
  0xc1   : > { %v578_v48 = vadd.f32 %v577_v46, %v469_v43  ;;  %v627_v56 = vadd.f32 %v1537_v32, %v602_v51 }
  0xc3   : > { %v619_v52 = vadd.f32 %v1537_v32, %v578_v48  ;;  %v643_v60 = vmax.f32 %v627_v56, 0.0 }
  0xc5   : > { %v635_v58 = vmax.f32 %v619_v52, 0.0  ;;  %659 = vst.msk [vmem:[%s1547_s25 + $0x68] sm:$0xff] %vm418_vm0, %v643_v60  ;;  %1296 = vmatmul.msk.f32.gmra.mxu3 %vm418_vm0, %v643_v60 }
  0xc6   : > { %v604_v1 = vpop.f32.mrf.mxu1 }
  0xc7   : > { %651 = vst.msk [vmem:[%s1547_s25 + $0x28] sm:$0xff] %vm418_vm0, %v635_v58  ;;  %1288 = vmatmul.msk.f32.gmra.mxu2 %vm418_vm0, %v635_v58  ;;  %v605_v2 = vadd.f32 %v604_v1, %v478_v63 }
  0xc8   : > { %v580_v28 = vpop.f32.mrf.mxu0 }
  0xc9   : > { %v581_v0 = vadd.f32 %v580_v28, %v470_v62  ;;  %v628_v5 = vadd.f32 %v1537_v32, %v605_v2  ;;  %v1744_v2 = vpop.permute.xlu2 %1026 }
  0xcb   : > { %v620_v3 = vadd.f32 %v1537_v32, %v581_v0  ;;  %v644_v9 = vmax.f32 %v628_v5, 0.0  ;;  %v1750_v5 = vpop.permute.xlu1 %1036 }
  0xcd   : > { %v636_v7 = vmax.f32 %v620_v3, 0.0  ;;  %660 = vst.msk [vmem:[%s1547_s25 + $0x70] sm:$0xff] %vm418_vm0, %v644_v9  ;;  %1297 = vmatmul.msk.f32.gmra.mxu3 %vm418_vm0, %v644_v9 }
  0xce   : > { %v607_v12 = vpop.f32.mrf.mxu1 }
  0xcf   : > { %652 = vst.msk [vmem:[%s1547_s25 + $0x30] sm:$0xff] %vm418_vm0, %v636_v7  ;;  %1289 = vmatmul.msk.f32.gmra.mxu2 %vm418_vm0, %v636_v7  ;;  %v608_v13 = vadd.f32 %v607_v12, %v479_v11 }
  0xd1   : > { %v629_v14 = vadd.f32 %v1537_v32, %v608_v13  ;;  %v1748_v4 = vpop.permute.xlu2 %1041 }
  0xd3   : > { %v645_v15 = vmax.f32 %v629_v14, 0.0 }
  0xd5   : > { %661 = vst.msk [vmem:[%s1547_s25 + $0x78] sm:$0xff] %vm418_vm0, %v645_v15  ;;  %1298 = vmatmul.msk.f32.gmra.mxu3 %vm418_vm0, %v645_v15 }
  0xd7   : > { %1290 = vmatmul.msk.f32.gmra.mxu2 %vm418_vm0, %v637_v38 }
  0xdf   : > { %1291 = vmatmul.msk.f32.gmra.mxu2 %vm418_vm0, %v638_v53 }
  0xf4   : > { %v1754_v7 = vpop.permute.xlu2 %1046 }
 0x100   : > { %v1760_v10 = vpop.permute.xlu2 %1056 }
 0x108   : > { %v1765_v14 = vpop.permute.xlu2 %1071 }
 0x10c   : > { %v1756_v8 = vpop.permute.xlu1 %1051 }
 0x112   : > { %v1746_v3 = vpop.permute.xlu0 %1031 }
 0x11a   : > { %v1752_v6 = vpop.permute.xlu0 %1066 }
 0x11c   : > { %v1762_v11 = vpop.permute.xlu1 %1061 }
 0x122   : > { %v735_v32 = vpop.f32.mrf.mxu2  ;;  %v1758_v9 = vpop.permute.xlu0 %1081 }
 0x123   : > { %v1665_v17 = vadd.f32 %v1662_v16, %v735_v32 }
 0x124   : > { %v1767_v15 = vpop.permute.xlu1 %1076 }
 0x125   : > { %v784_v34 = vsel %vm783_vm2, %v1665_v17, -inf }
 0x126   : > { %785 = vmax.xlane.f32.xlu0 %v784_v34 }
 0x128   : > { %v762_v49 = vpop.f32.mrf.mxu3 }
 0x129   : > { %v1675_v19 = vadd.f32 %v1662_v16, %v762_v49 }
 0x12a   : > { %v738_v38 = vpop.f32.mrf.mxu2 }
 0x12b   : > { %v1670_v18 = vadd.f32 %v1662_v16, %v738_v38  ;;  %v811_v24 = vsel %vm783_vm2, %v1675_v19, -inf }
 0x12d   : > { %v787_v53 = vsel %vm783_vm2, %v1670_v18, -inf }
 0x12e   : > { %788 = vmax.xlane.f32.xlu0 %v787_v53 }
 0x130   : > { %v765_v22 = vpop.f32.mrf.mxu3 }
 0x131   : > { %v1685_v25 = vadd.f32 %v1662_v16, %v765_v22 }
 0x132   : > { %v741_v20 = vpop.f32.mrf.mxu2 }
 0x133   : > { %v1678_v21 = vadd.f32 %v1662_v16, %v741_v20  ;;  %v814_v30 = vsel %vm783_vm2, %v1685_v25, -inf }
 0x135   : > { %v790_v23 = vsel %vm783_vm2, %v1678_v21, -inf }
 0x136   : > { %791 = vmax.xlane.f32.xlu1 %v790_v23  ;;  %812 = vmax.xlane.f32.xlu0 %v811_v24 }
 0x138   : > { %v768_v27 = vpop.f32.mrf.mxu3 }
 0x139   : > { %v1688_v29 = vadd.f32 %v1662_v16, %v768_v27 }
 0x13a   : > { %v744_v26 = vpop.f32.mrf.mxu2 }
 0x13b   : > { %v817_v31 = vsel %vm783_vm2, %v1688_v29, -inf  ;;  %v1695_v33 = vadd.f32 %v1662_v16, %v744_v26 }
 0x13c   : > { %818 = vmax.xlane.f32.xlu2 %v817_v31 }
 0x13d   : > { %v793_v42 = vsel %vm783_vm2, %v1695_v33, -inf }
 0x13e   : > { %815 = vmax.xlane.f32.xlu1 %v814_v30 }
 0x140   : > { %v771_v39 = vpop.f32.mrf.mxu3 }
 0x141   : > { %v1701_v40 = vadd.f32 %v1662_v16, %v771_v39 }
 0x142   : > { %v747_v35 = vpop.f32.mrf.mxu2 }
 0x143   : > { %v1698_v36 = vadd.f32 %v1662_v16, %v747_v35  ;;  %v820_v43 = vsel %vm783_vm2, %v1701_v40, -inf }
 0x144   : > { %821 = vmax.xlane.f32.xlu0 %v820_v43 }
 0x145   : > { %v796_v41 = vsel %vm783_vm2, %v1698_v36, -inf }
 0x146   : > { %794 = vmax.xlane.f32.xlu1 %v793_v42  ;;  %797 = vmax.xlane.f32.xlu2 %v796_v41 }
 0x148   : > { %v774_v46 = vpop.f32.mrf.mxu3 }
 0x149   : > { %v1713_v47 = vadd.f32 %v1662_v16, %v774_v46 }
 0x14a   : > { %v750_v44 = vpop.f32.mrf.mxu2 }
 0x14b   : > { %v1710_v45 = vadd.f32 %v1662_v16, %v750_v44  ;;  %v823_v50 = vsel %vm783_vm2, %v1713_v47, -inf }
 0x14d   : > { %v799_v48 = vsel %vm783_vm2, %v1710_v45, -inf }
 0x14e   : > { %800 = vmax.xlane.f32.xlu2 %v799_v48  ;;  %824 = vmax.xlane.f32.xlu1 %v823_v50 }
 0x150   : > { %v777_v54 = vpop.f32.mrf.mxu3 }
 0x151   : > { %v1723_v55 = vadd.f32 %v1662_v16, %v777_v54 }
 0x152   : > { %v753_v51 = vpop.f32.mrf.mxu2 }
 0x153   : > { %v1720_v52 = vadd.f32 %v1662_v16, %v753_v51  ;;  %v826_v57 = vsel %vm783_vm2, %v1723_v55, -inf }
 0x155   : > { %v802_v56 = vsel %vm783_vm2, %v1720_v52, -inf }
 0x156   : > { %803 = vmax.xlane.f32.xlu0 %v802_v56  ;;  %827 = vmax.xlane.f32.xlu2 %v826_v57 }
 0x158   : > { %v780_v60 = vpop.f32.mrf.mxu3 }
 0x159   : > { %v1733_v61 = vadd.f32 %v1662_v16, %v780_v60 }
 0x15a   : > { %v756_v58 = vpop.f32.mrf.mxu2 }
 0x15b   : > { %v1730_v59 = vadd.f32 %v1662_v16, %v756_v58  ;;  %v829_v28 = vsel %vm783_vm2, %v1733_v61, -inf }
 0x15d   : > { %v805_v62 = vsel %vm783_vm2, %v1730_v59, -inf }
 0x15e   : > { %806 = vmax.xlane.f32.xlu1 %v805_v62  ;;  %830 = vmax.xlane.f32.xlu0 %v829_v28 }
 0x162   : > { %v759_v63 = vpop.f32.mrf.mxu2 }
 0x163   : > { %v1740_v0 = vadd.f32 %v1662_v16, %v759_v63 }
 0x165   : > { %v808_v1 = vsel %vm783_vm2, %v1740_v0, -inf }
 0x166   : > { %809 = vmax.xlane.f32.xlu2 %v808_v1 }
 0x199   : > { %v786_v12 = vpop.xlane.xlu0 %785 }
 0x19a   : > { %v832_v13 = vsub.f32 %v1665_v17, %v786_v12  ;;  %v1774_v17 = vpop.permute.xlu2 %1086 }
 0x19c   : > { %v848_v37 = vmul.f32 1.442695, %v832_v13 }
 0x19e   : > { %1325 = vpow2.f32 %v848_v37 }
 0x1a1   : > { %v789_v16 = vpop.xlane.xlu0 %788 }
 0x1a2   : > { %v833_v32 = vsub.f32 %v1670_v18, %v789_v16 }
 0x1a4   : > { %v1770_v34 = vpop.eup %1325  ;;  %v850_v38 = vmul.f32 1.442695, %v833_v32 }
 0x1a5   : > { %v880_v49 = vsel %vm783_vm2, %v1770_v34, 0.0 }
 0x1a6   : > { %1327 = vpow2.f32 %v850_v38  ;;  %881 = vadd.xlane.f32.xlu1 %v880_v49 }
 0x1a9   : > { %v792_v53 = vpop.xlane.xlu1 %791  ;;  %v813_v20 = vpop.xlane.xlu0 %812 }
 0x1aa   : > { %v834_v22 = vsub.f32 %v1678_v21, %v792_v53  ;;  %v841_v23 = vsub.f32 %v1675_v19, %v813_v20 }
 0x1ac   : > { %v1778_v24 = vpop.eup %1327  ;;  %v852_v26 = vmul.f32 1.442695, %v834_v22  ;;  %v866_v18 = vmul.f32 1.442695, %v841_v23 }
 0x1ad   : > { %v883_v27 = vsel %vm783_vm2, %v1778_v24, 0.0 }
 0x1ae   : > { %1329 = vpow2.f32 %v852_v26  ;;  %884 = vadd.xlane.f32.xlu2 %v883_v27 }
 0x1af   : > { %1331 = vpow2.f32 %v866_v18  ;;  %v819_v31 = vpop.xlane.xlu2 %818 }
 0x1b0   : > { %v843_v39 = vsub.f32 %v1688_v29, %v819_v31 }
 0x1b1   : > { %v816_v30 = vpop.xlane.xlu1 %815 }
 0x1b2   : > { %v842_v35 = vsub.f32 %v1685_v25, %v816_v30  ;;  %v870_v42 = vmul.f32 1.442695, %v843_v39 }
 0x1b4   : > { %v1784_v41 = vpop.eup %1329  ;;  %v868_v21 = vmul.f32 1.442695, %v842_v35 }
 0x1b5   : > { %v1786_v19 = vpop.eup %1331  ;;  %v886_v43 = vsel %vm783_vm2, %v1784_v41, 0.0 }
 0x1b6   : > { %1333 = vpow2.f32 %v868_v21  ;;  %887 = vadd.xlane.f32.xlu0 %v886_v43  ;;  %v907_v44 = vsel %vm783_vm2, %v1786_v19, 0.0 }
 0x1b7   : > { %1335 = vpow2.f32 %v870_v42  ;;  %908 = vadd.xlane.f32.xlu1 %v907_v44  ;;  %v822_v48 = vpop.xlane.xlu0 %821 }
 0x1b8   : > { %v844_v56 = vsub.f32 %v1701_v40, %v822_v48 }
 0x1b9   : > { %v795_v46 = vpop.xlane.xlu1 %794  ;;  %v798_v25 = vpop.xlane.xlu2 %797 }
 0x1ba   : > { %v835_v29 = vsub.f32 %v1695_v33, %v795_v46  ;;  %v836_v50 = vsub.f32 %v1698_v36, %v798_v25  ;;  %v872_v33 = vmul.f32 1.442695, %v844_v56 }
 0x1bc   : > { %v1794_v51 = vpop.eup %1333  ;;  %v854_v54 = vmul.f32 1.442695, %v835_v29  ;;  %v856_v58 = vmul.f32 1.442695, %v836_v50 }
 0x1bd   : > { %v1797_v57 = vpop.eup %1335  ;;  %v910_v60 = vsel %vm783_vm2, %v1794_v51, 0.0 }
 0x1be   : > { %1337 = vpow2.f32 %v854_v54  ;;  %v913_v62 = vsel %vm783_vm2, %v1797_v57, 0.0  ;;  %911 = vadd.xlane.f32.xlu2 %v910_v60  ;;  %v1021_v60 = vld [vmem:[%s1585_s28 + $0x68] sm:$0xff] }
 0x1bf   : > { %1339 = vpow2.f32 %v856_v58  ;;  %914 = vadd.xlane.f32.xlu0 %v913_v62  ;;  %v1022_v62 = vld [vmem:[%s1585_s28 + $0x70] sm:$0xff] }
 0x1c0   : > { %1341 = vpow2.f32 %v872_v33 }
 0x1c1   : > { %v801_v36 = vpop.xlane.xlu2 %800  ;;  %v825_v28 = vpop.xlane.xlu1 %824 }
 0x1c2   : > { %v837_v63 = vsub.f32 %v1710_v45, %v801_v36  ;;  %v845_v40 = vsub.f32 %v1713_v47, %v825_v28 }
 0x1c4   : > { %v1805_v1 = vpop.eup %1337  ;;  %v858_v13 = vmul.f32 1.442695, %v837_v63  ;;  %v874_v37 = vmul.f32 1.442695, %v845_v40 }
 0x1c5   : > { %v1807_v12 = vpop.eup %1339  ;;  %v889_v16 = vsel %vm783_vm2, %v1805_v1, 0.0 }
 0x1c6   : > { %v892_v32 = vsel %vm783_vm2, %v1807_v12, 0.0  ;;  %890 = vadd.xlane.f32.xlu1 %v889_v16  ;;  %1343 = vpow2.f32 %v858_v13  ;;  %v1813_v38 = vpop.eup %1341 }
 0x1c7   : > { %893 = vadd.xlane.f32.xlu2 %v892_v32  ;;  %1345 = vpow2.f32 %v874_v37  ;;  %v916_v26 = vsel %vm783_vm2, %v1813_v38, 0.0 }
 0x1c9   : > { %v804_v45 = vpop.xlane.xlu0 %803  ;;  %v828_v47 = vpop.xlane.xlu2 %827 }
 0x1ca   : > { %v838_v49 = vsub.f32 %v1720_v52, %v804_v45  ;;  %v846_v53 = vsub.f32 %v1723_v55, %v828_v47 }
 0x1cc   : > { %v860_v20 = vmul.f32 1.442695, %v838_v49  ;;  %v1817_v22 = vpop.eup %1343  ;;  %v876_v23 = vmul.f32 1.442695, %v846_v53 }
 0x1cd   : > { %v1821_v18 = vpop.eup %1345  ;;  %v895_v27 = vsel %vm783_vm2, %v1817_v22, 0.0 }
 0x1ce   : > { %1347 = vpow2.f32 %v860_v20  ;;  %917 = vadd.xlane.f32.xlu1 %v916_v26  ;;  %896 = vadd.xlane.f32.xlu0 %v895_v27  ;;  %v919_v52 = vsel %vm783_vm2, %v1821_v18, 0.0 }
 0x1cf   : > { %1349 = vpow2.f32 %v876_v23  ;;  %920 = vadd.xlane.f32.xlu2 %v919_v52 }
 0x1d1   : > { %v807_v55 = vpop.xlane.xlu1 %806  ;;  %v831_v31 = vpop.xlane.xlu0 %830 }
 0x1d2   : > { %v839_v30 = vsub.f32 %v1730_v59, %v807_v55  ;;  %v847_v35 = vsub.f32 %v1733_v61, %v831_v31 }
 0x1d4   : > { %v1829_v39 = vpop.eup %1347  ;;  %v862_v21 = vmul.f32 1.442695, %v839_v30  ;;  %v878_v43 = vmul.f32 1.442695, %v847_v35 }
 0x1d5   : > { %v1831_v42 = vpop.eup %1349  ;;  %v898_v44 = vsel %vm783_vm2, %v1829_v39, 0.0 }
 0x1d6   : > { %1351 = vpow2.f32 %v862_v21  ;;  %v922_v46 = vsel %vm783_vm2, %v1831_v42, 0.0  ;;  %899 = vadd.xlane.f32.xlu1 %v898_v44 }
 0x1d7   : > { %1353 = vpow2.f32 %v878_v43  ;;  %923 = vadd.xlane.f32.xlu0 %v922_v46 }
 0x1d9   : > { %v810_v59 = vpop.xlane.xlu2 %809 }
 0x1da   : > { %v840_v61 = vsub.f32 %v1740_v0, %v810_v59  ;;  %v1023_v0 = vld [vmem:[%s1585_s28 + $0x78] sm:$0xff] }
 0x1dc   : > { %v1838_v25 = vpop.eup %1351  ;;  %v864_v29 = vmul.f32 1.442695, %v840_v61 }
 0x1dd   : > { %v1840_v48 = vpop.eup %1353  ;;  %v901_v50 = vsel %vm783_vm2, %v1838_v25, 0.0 }
 0x1de   : > { %1355 = vpow2.f32 %v864_v29  ;;  %902 = vadd.xlane.f32.xlu2 %v901_v50  ;;  %v925_v54 = vsel %vm783_vm2, %v1840_v48, 0.0 }
 0x1df   : > { %926 = vadd.xlane.f32.xlu1 %v925_v54 }
 0x1e4   : > { %v1846_v56 = vpop.eup %1355 }
 0x1e5   : > { %v904_v58 = vsel %vm783_vm2, %v1846_v56, 0.0 }
 0x1e6   : > { %905 = vadd.xlane.f32.xlu0 %v904_v58 }
 0x1f6   : > { %1101 = vperm.xlu2 %1320, %v1023_v0  }
 0x1f8   : > { %1091 = vperm.xlu1 %1322, %v1021_v60  }
 0x1fa   : > { %1096 = vperm.xlu0 %1321, %v1022_v62  }
 0x219   : > { %v882_v33 = vpop.xlane.xlu1 %881 }
 0x21a   : > { %1357 = vrcp.f32 %v882_v33 }
 0x220   : > { %v1358_v36 = vpop.eup %1357 }
 0x221   : > { %v944_v28 = vmul.f32 %v1358_v36, %v882_v33  ;;  %v885_v63 = vpop.xlane.xlu2 %884 }
 0x222   : > { %1359 = vrcp.f32 %v885_v63 }
 0x223   : > { %v960_v40 = vsub.f32 2.0, %v944_v28 }
 0x225   : > { %v976_v13 = vmul.f32 %v1358_v36, %v960_v40 }
 0x227   : > { %v992_v37 = vmul.f32 %v1770_v34, %v976_v13 }
 0x228   : > { %v1360_v16 = vpop.eup %1359 }
 0x229   : > { %v1104_v32 = vmul.f32 %v1744_v2, %v992_v37  ;;  %v945_v45 = vmul.f32 %v1360_v16, %v885_v63  ;;  %v888_v47 = vpop.xlane.xlu0 %887 }
 0x22a   : > { %v909_v49 = vpop.xlane.xlu1 %908  ;;  %1361 = vrcp.f32 %v888_v47 }
 0x22b   : > { %1120 = vst.msk [vmem:[%s1858_s14] sm:$0xff] %vm783_vm2, %v1104_v32  ;;  %v961_v53 = vsub.f32 2.0, %v945_v45  ;;  %1363 = vrcp.f32 %v909_v49 }
 0x22d   : > { %v977_v20 = vmul.f32 %v1360_v16, %v961_v53 }
 0x22f   : > { %v993_v34 = vmul.f32 %v1778_v24, %v977_v20 }
 0x230   : > { %v1362_v23 = vpop.eup %1361 }
 0x231   : > { %v1364_v26 = vpop.eup %1363  ;;  %v1105_v27 = vmul.f32 %v1746_v3, %v993_v34  ;;  %v946_v52 = vmul.f32 %v1362_v23, %v888_v47  ;;  %v912_v55 = vpop.xlane.xlu2 %911 }
 0x232   : > { %v953_v30 = vmul.f32 %v1364_v26, %v909_v49  ;;  %1365 = vrcp.f32 %v912_v55  ;;  %v915_v2 = vpop.xlane.xlu0 %914 }
 0x233   : > { %1121 = vst.msk [vmem:[%s1858_s14 + $0x8] sm:$0xff] %vm783_vm2, %v1105_v27  ;;  %v962_v31 = vsub.f32 2.0, %v946_v52  ;;  %1367 = vrcp.f32 %v915_v2 }
 0x234   : > { %v969_v35 = vsub.f32 2.0, %v953_v30 }
 0x235   : > { %v978_v21 = vmul.f32 %v1362_v23, %v962_v31 }
 0x236   : > { %v985_v43 = vmul.f32 %v1364_v26, %v969_v35 }
 0x237   : > { %v994_v24 = vmul.f32 %v1784_v41, %v978_v21 }
 0x238   : > { %v1366_v44 = vpop.eup %1365  ;;  %v1001_v46 = vmul.f32 %v1786_v19, %v985_v43 }
 0x239   : > { %v1368_v3 = vpop.eup %1367  ;;  %v1106_v59 = vmul.f32 %v1750_v5, %v994_v24  ;;  %v954_v61 = vmul.f32 %v1366_v44, %v912_v55  ;;  %v891_v29 = vpop.xlane.xlu1 %890 }
 0x23a   : > { %v1113_v50 = vmul.f32 %v1765_v14, %v1001_v46  ;;  %v955_v54 = vmul.f32 %v1368_v3, %v915_v2  ;;  %v894_v58 = vpop.xlane.xlu2 %893  ;;  %1369 = vrcp.f32 %v891_v29 }
 0x23b   : > { %1122 = vst.msk [vmem:[%s1858_s14 + $0x10] sm:$0xff] %vm783_vm2, %v1106_v59  ;;  %v970_v0 = vsub.f32 2.0, %v954_v61  ;;  %1371 = vrcp.f32 %v894_v58 }
 0x23c   : > { %1129 = vst.msk [vmem:[%s1858_s14 + $0x48] sm:$0xff] %vm783_vm2, %v1113_v50  ;;  %v971_v41 = vsub.f32 2.0, %v955_v54 }
 0x23d   : > { %v986_v60 = vmul.f32 %v1366_v44, %v970_v0 }
 0x23e   : > { %v987_v19 = vmul.f32 %v1368_v3, %v971_v41 }
 0x23f   : > { %v1002_v5 = vmul.f32 %v1794_v51, %v986_v60 }
 0x240   : > { %v1370_v62 = vpop.eup %1369  ;;  %v1003_v33 = vmul.f32 %v1797_v57, %v987_v19 }
 0x241   : > { %v1372_v14 = vpop.eup %1371  ;;  %v1114_v36 = vmul.f32 %v1767_v15, %v1002_v5  ;;  %v947_v28 = vmul.f32 %v1370_v62, %v891_v29  ;;  %v918_v63 = vpop.xlane.xlu1 %917 }
 0x242   : > { %v1115_v40 = vmul.f32 %v1758_v9, %v1003_v33  ;;  %v948_v13 = vmul.f32 %v1372_v14, %v894_v58  ;;  %1373 = vrcp.f32 %v918_v63  ;;  %v897_v37 = vpop.xlane.xlu0 %896  ;;  %v921_v53 = vpop.xlane.xlu2 %920 }
 0x243   : > { %1130 = vst.msk [vmem:[%s1858_s14 + $0x50] sm:$0xff] %vm783_vm2, %v1114_v36  ;;  %v963_v16 = vsub.f32 2.0, %v947_v28  ;;  %1375 = vrcp.f32 %v897_v37 }
 0x244   : > { %1131 = vst.msk [vmem:[%s1858_s14 + $0x58] sm:$0xff] %vm783_vm2, %v1115_v40  ;;  %v964_v51 = vsub.f32 2.0, %v948_v13 }
 0x245   : > { %v979_v57 = vmul.f32 %v1370_v62, %v963_v16 }
 0x246   : > { %v980_v32 = vmul.f32 %v1372_v14, %v964_v51 }
 0x247   : > { %v995_v15 = vmul.f32 %v1805_v1, %v979_v57 }
 0x248   : > { %v1374_v45 = vpop.eup %1373  ;;  %v996_v47 = vmul.f32 %v1807_v12, %v980_v32 }
 0x249   : > { %v1376_v9 = vpop.eup %1375  ;;  %v1107_v49 = vmul.f32 %v1748_v4, %v995_v15  ;;  %v956_v20 = vmul.f32 %v1374_v45, %v918_v63  ;;  %v900_v34 = vpop.xlane.xlu1 %899 }
 0x24a   : > { %v1108_v23 = vmul.f32 %v1754_v7, %v996_v47  ;;  %v949_v26 = vmul.f32 %v1376_v9, %v897_v37  ;;  %1377 = vrcp.f32 %v900_v34  ;;  %v924_v31 = vpop.xlane.xlu0 %923 }
 0x24b   : > { %1123 = vst.msk [vmem:[%s1858_s14 + $0x18] sm:$0xff] %vm783_vm2, %v1107_v49  ;;  %v972_v27 = vsub.f32 2.0, %v956_v20 }
 0x24c   : > { %1124 = vst.msk [vmem:[%s1858_s14 + $0x20] sm:$0xff] %vm783_vm2, %v1108_v23  ;;  %v965_v1 = vsub.f32 2.0, %v949_v26 }
 0x24d   : > { %v988_v52 = vmul.f32 %v1374_v45, %v972_v27 }
 0x24e   : > { %v981_v12 = vmul.f32 %v1376_v9, %v965_v1 }
 0x24f   : > { %v1004_v55 = vmul.f32 %v1813_v38, %v988_v52 }
 0x250   : > { %v1378_v4 = vpop.eup %1377  ;;  %v997_v30 = vmul.f32 %v1817_v22, %v981_v12 }
 0x251   : > { %v1116_v2 = vmul.f32 %v1774_v17, %v1004_v55  ;;  %v950_v7 = vmul.f32 %v1378_v4, %v900_v34  ;;  %v903_v35 = vpop.xlane.xlu2 %902 }
 0x252   : > { %v1109_v21 = vmul.f32 %v1756_v8, %v997_v30  ;;  %1379 = vrcp.f32 %v903_v35  ;;  %v927_v43 = vpop.xlane.xlu1 %926 }
 0x253   : > { %1132 = vst.msk [vmem:[%s1858_s14 + $0x60] sm:$0xff] %vm783_vm2, %v1116_v2  ;;  %v966_v24 = vsub.f32 2.0, %v950_v7  ;;  %1381 = vrcp.f32 %v927_v43 }
 0x254   : > { %1383 = vrcp.f32 %v921_v53  ;;  %1125 = vst.msk [vmem:[%s1858_s14 + $0x28] sm:$0xff] %vm783_vm2, %v1109_v21 }
 0x255   : > { %v982_v38 = vmul.f32 %v1378_v4, %v966_v24  ;;  %1385 = vrcp.f32 %v924_v31 }
 0x257   : > { %v998_v22 = vmul.f32 %v1829_v39, %v982_v38 }
 0x258   : > { %v1380_v17 = vpop.eup %1379 }
 0x259   : > { %v1382_v44 = vpop.eup %1381  ;;  %v1110_v46 = vmul.f32 %v1760_v10, %v998_v22  ;;  %v951_v3 = vmul.f32 %v1380_v17, %v903_v35  ;;  %v906_v8 = vpop.xlane.xlu0 %905 }
 0x25a   : > { %v1384_v59 = vpop.eup %1383  ;;  %v959_v61 = vmul.f32 %v1382_v44, %v927_v43  ;;  %1387 = vrcp.f32 %v906_v8  ;;  %v1102_v33 = vpop.permute.xlu2 %1101 }
 0x25b   : > { %1126 = vst.msk [vmem:[%s1858_s14 + $0x30] sm:$0xff] %vm783_vm2, %v1110_v46  ;;  %v967_v29 = vsub.f32 2.0, %v951_v3  ;;  %v1386_v50 = vpop.eup %1385  ;;  %v957_v58 = vmul.f32 %v1384_v59, %v921_v53 }
 0x25c   : > { %v975_v54 = vsub.f32 2.0, %v959_v61  ;;  %v958_v39 = vmul.f32 %v1386_v50, %v924_v31 }
 0x25d   : > { %v983_v0 = vmul.f32 %v1380_v17, %v967_v29  ;;  %v973_v5 = vsub.f32 2.0, %v957_v58 }
 0x25e   : > { %v991_v41 = vmul.f32 %v1382_v44, %v975_v54  ;;  %v974_v28 = vsub.f32 2.0, %v958_v39 }
 0x25f   : > { %v999_v60 = vmul.f32 %v1838_v25, %v983_v0  ;;  %v989_v40 = vmul.f32 %v1384_v59, %v973_v5 }
 0x260   : > { %v1388_v19 = vpop.eup %1387  ;;  %v1007_v10 = vmul.f32 %v1840_v48, %v991_v41  ;;  %v990_v13 = vmul.f32 %v1386_v50, %v974_v28 }
 0x261   : > { %v1111_v62 = vmul.f32 %v1762_v11, %v999_v60  ;;  %v952_v14 = vmul.f32 %v1388_v19, %v906_v8  ;;  %v1005_v11 = vmul.f32 %v1821_v18, %v989_v40 }
 0x262   : > { %v1119_v36 = vmul.f32 %v1102_v33, %v1007_v10  ;;  %v1006_v57 = vmul.f32 %v1831_v42, %v990_v13 }
 0x263   : > { %1127 = vst.msk [vmem:[%s1858_s14 + $0x38] sm:$0xff] %vm783_vm2, %v1111_v62  ;;  %v968_v63 = vsub.f32 2.0, %v952_v14 }
 0x264   : > { %1135 = vst.msk [vmem:[%s1858_s14 + $0x78] sm:$0xff] %vm783_vm2, %v1119_v36 }
 0x265   : > { %v984_v25 = vmul.f32 %v1388_v19, %v968_v63 }
 0x267   : > { %v1000_v48 = vmul.f32 %v1846_v56, %v984_v25 }
 0x269   : > { %v1112_v37 = vmul.f32 %v1752_v6, %v1000_v48 }
 0x26a   : > { %v1092_v16 = vpop.permute.xlu1 %1091 }
 0x26b   : > { %1128 = vst.msk [vmem:[%s1858_s14 + $0x40] sm:$0xff] %vm783_vm2, %v1112_v37  ;;  %v1117_v51 = vmul.f32 %v1092_v16, %v1005_v11 }
 0x26c   : > { %v1097_v32 = vpop.permute.xlu0 %1096 }
 0x26d   : > { %1133 = vst.msk [vmem:[%s1858_s14 + $0x68] sm:$0xff] %vm783_vm2, %v1117_v51  ;;  %v1118_v15 = vmul.f32 %v1097_v32, %v1006_v57 }
 0x26f   : > { %1134 = vst.msk [vmem:[%s1858_s14 + $0x70] sm:$0xff] %vm783_vm2, %v1118_v15 }
 0x270 PF: > { %s20_s30 = sadd.s32 1, %s1395_s30  }
 0x271   : > { %p17_p5 = scmp.ge.s32.totalorder %s20_s30, 4  }
 0x273   :  { %19 = sbr.rel (!%p17_p5) target bundleno = 1 (0x1), region = 100 }

</bundles_post_ra>
